<compile_context>
chip_gen: v7x
topology: tpu7x:2x2x1
jax: 0.10.0
libtpu: 0.0.40
codegen_flags: <defaults>
</compile_context>

<pallas_src>
import functools

import jax
import jax.numpy as jnp
from jax.experimental import pallas as pl
from jax.experimental.pallas import tpu as pltpu

# Logical (torch) dims.
D_IN = 400
D_H = 100
D_Z = 20

# Padded (lane-dense) dims.
DP_IN = 512          # 4 * 128
DP_H = 128
DP_Z = 128           # packed head: mu in lanes [0, 20), logvar in lanes [64, 84)
LV_OFF = 64          # lane offset of logvar inside the packed head


def _round_up(x, m):
    return (x + m - 1) // m * m


def _pad2(a, rows, cols):
    return jnp.pad(a, ((0, rows - a.shape[0]), (0, cols - a.shape[1])))


# --------------------------------------------------------------------------- kernel


def _vae_kernel(x_ref, eps_ref,
                w1_ref, b1_ref,
                wh_ref, bh_ref,
                w3_ref, b3_ref,
                w4_ref, b4_ref,
                recon_ref, head_ref):
    x = x_ref[...]                                                      # (TB, 512) bf16

    # ---- encode: fc1 + relu (bf16 operands, f32 MXU accumulate) -------------
    h1 = jnp.dot(x, w1_ref[...], preferred_element_type=jnp.float32) + b1_ref[...]
    h1 = jnp.maximum(h1, 0.0)                                           # (TB, 128) f32

    # ---- packed fc21|fc22 head: mu lanes [0,64), logvar lanes [64,128) ------
    head = jnp.dot(h1.astype(jnp.bfloat16), wh_ref[...],
                   preferred_element_type=jnp.float32) + bh_ref[...]    # (TB, 128) f32

    # ---- reparameterize (f32 elementwise) -----------------------------------
    # Roll by 64 lanes (XLU) so logvar lands on the mu/eps lanes.  eps is zero
    # outside lanes [0,20), so the exp(0.5*mu) values that wrap into the upper
    # half are multiplied away; the logvar values left in z's upper lanes only
    # ever multiply the zero rows of the padded fc3 weight.
    logvar_aligned = pltpu.roll(head, shift=LV_OFF, axis=1)
    std = jnp.exp(0.5 * logvar_aligned)
    z = head + eps_ref[...] * std                                       # (TB, 128) f32

    # ---- decode: fc3 + relu, fc4 + sigmoid ----------------------------------
    h3 = jnp.dot(z.astype(jnp.bfloat16), w3_ref[...],
                 preferred_element_type=jnp.float32) + b3_ref[...]      # (TB, 512)
    h3 = jnp.maximum(h3, 0.0)
    logits = jnp.dot(h3.astype(jnp.bfloat16), w4_ref[...],
                     preferred_element_type=jnp.float32) + b4_ref[...]  # (TB, 512)

    recon_ref[...] = jax.nn.sigmoid(logits).astype(recon_ref.dtype)     # bf16 store
    head_ref[...] = head                                                # mu | logvar


# --------------------------------------------------------------------------- wrapper


def prepare_params(params):
    """Pad weights to lane-dense shapes, pack fc21|fc22 into one 128-lane head, and
    cast matmul weights to bf16.  All padded regions are exactly zero so the padded
    math is exact on the real lanes."""
    w1 = _pad2(params["w1"], DP_IN, DP_H).astype(jnp.bfloat16)          # (512, 128)
    b1 = _pad2(params["b1"], 1, DP_H)                                   # (1, 128) f32

    wh = jnp.zeros((DP_H, DP_Z), jnp.float32)
    wh = wh.at[:D_H, :D_Z].set(params["w21"])
    wh = wh.at[:D_H, LV_OFF:LV_OFF + D_Z].set(params["w22"])
    wh = wh.astype(jnp.bfloat16)                                        # (128, 128)
    bh = jnp.zeros((1, DP_Z), jnp.float32)
    bh = bh.at[:, :D_Z].set(params["b21"])
    bh = bh.at[:, LV_OFF:LV_OFF + D_Z].set(params["b22"])               # (1, 128) f32

    w3 = _pad2(params["w3"], DP_Z, DP_IN).astype(jnp.bfloat16)          # (128, 512)
    b3 = _pad2(params["b3"], 1, DP_IN)                                  # (1, 512) f32
    w4 = _pad2(params["w4"], DP_IN, DP_IN).astype(jnp.bfloat16)         # (512, 512)
    b4 = _pad2(params["b4"], 1, DP_IN)                                  # (1, 512) f32
    return dict(w1=w1, b1=b1, wh=wh, bh=bh, w3=w3, b3=b3, w4=w4, b4=b4)


@functools.partial(jax.jit, static_argnames=("tb",))
def vae_forward(x, prepared, eps, *, tb=None):
    """x: (B, 1, 20, 20) f32, eps: (B, 20) f32.

    Returns (recon (B,400) bf16, mu (B,20) f32, logvar (B,20) f32), matching the
    torch VAE.forward math (recon in bf16 per the memory-bound perf review)."""
    B = x.shape[0]

    # Batch tile: 512-row tiles (85%-of-roofline regime), 8-row minimum; bump to an
    # even tile count so the parallel batch axis splits over both v7x TensorCores.
    if tb is None:
        tb = min(512, _round_up(max(B, 1), 8))
        nt = -(-B // tb)
        if nt > 1 and nt % 2 == 1:
            nt += 1
            tb = _round_up(-(-B // nt), 8)
    Bp = _round_up(max(B, 1), tb)
    num_tiles = Bp // tb

    # Fused reshape + pad + bf16 cast (one XLA fusion; ships half the x bytes).
    xp = jnp.pad(x.reshape(B, D_IN),
                 ((0, Bp - B), (0, DP_IN - D_IN))).astype(jnp.bfloat16)
    epsp = jnp.pad(eps, ((0, Bp - B), (0, DP_Z - D_Z)))                  # f32

    # Activations tile over the batch; weights/biases use a constant block index so
    # the pipeline keeps them resident in VMEM (never re-DMA'd after step 0).
    def row_spec(cols):
        return pl.BlockSpec((tb, cols), lambda i: (i, 0))

    def const_spec(shape):
        return pl.BlockSpec(shape, lambda i: (0, 0))

    in_specs = [
        row_spec(DP_IN),                  # x (bf16)
        row_spec(DP_Z),                   # eps (f32)
        const_spec((DP_IN, DP_H)),        # w1
        const_spec((1, DP_H)),            # b1
        const_spec((DP_H, DP_Z)),         # wh (packed fc21|fc22)
        const_spec((1, DP_Z)),            # bh
        const_spec((DP_Z, DP_IN)),        # w3
        const_spec((1, DP_IN)),           # b3
        const_spec((DP_IN, DP_IN)),       # w4
        const_spec((1, DP_IN)),           # b4
    ]
    out_specs = (row_spec(DP_IN), row_spec(DP_Z))

    flops = 2 * Bp * (DP_IN * DP_H + DP_H * DP_Z + DP_Z * DP_IN + DP_IN * DP_IN)
    transcendentals = Bp * (DP_Z + DP_IN)            # exp(std) + sigmoid (advisory)
    weight_bytes = (2 * (DP_IN * DP_H + DP_H * DP_Z + DP_Z * DP_IN + DP_IN * DP_IN)
                    + 4 * (DP_H + DP_Z + 2 * DP_IN))
    bytes_accessed = weight_bytes + Bp * (2 * DP_IN + 4 * DP_Z       # x (bf16), eps
                                          + 2 * DP_IN + 4 * DP_Z)    # recon (bf16), head

    recon_p, head_p = pl.pallas_call(
        _vae_kernel,
        out_shape=(
            jax.ShapeDtypeStruct((Bp, DP_IN), jnp.bfloat16),
            jax.ShapeDtypeStruct((Bp, DP_Z), jnp.float32),
        ),
        grid_spec=pltpu.PrefetchScalarGridSpec(
            num_scalar_prefetch=0,
            grid=(num_tiles,),
            in_specs=in_specs,
            out_specs=out_specs,
        ),
        compiler_params=pltpu.CompilerParams(
            dimension_semantics=("parallel",),
        ),
        cost_estimate=pl.CostEstimate(
            flops=flops,
            transcendentals=transcendentals,
            bytes_accessed=bytes_accessed,
        ),
    )(xp, epsp,
      prepared["w1"], prepared["b1"],
      prepared["wh"], prepared["bh"],
      prepared["w3"], prepared["b3"],
      prepared["w4"], prepared["b4"])

    # TODO(synk): for a fully fused training step (BCE+KL), keep the padded
    # (Bp,512)/(Bp,128) outputs end-to-end and fold the loss reduction into the
    # kernel instead of slicing here.
    recon = recon_p[:B, :D_IN]
    mu = head_p[:B, :D_Z]
    logvar = head_p[:B, LV_OFF:LV_OFF + D_Z]
    return recon, mu, logvar


# --------------------------------------------------------------------------- init & refs


def init_params(key):
    """torch.nn.Linear-style init (uniform +-1/sqrt(fan_in)); weights stored as (in, out)."""
    def linear(k, fan_in, fan_out):
        kw, kb = jax.random.split(k)
        bound = 1.0 / jnp.sqrt(fan_in)
        w = jax.random.uniform(kw, (fan_in, fan_out), jnp.float32, -bound, bound)
        b = jax.random.uniform(kb, (1, fan_out), jnp.float32, -bound, bound)
        return w, b

    k1, k21, k22, k3, k4 = jax.random.split(key, 5)
    w1, b1 = linear(k1, D_IN, D_H)       # fc1:  400 -> 100
    w21, b21 = linear(k21, D_H, D_Z)     # fc21: 100 -> 20
    w22, b22 = linear(k22, D_H, D_Z)     # fc22: 100 -> 20
    w3, b3 = linear(k3, D_Z, D_IN)       # fc3:  20  -> 400
    w4, b4 = linear(k4, D_IN, D_IN)      # fc4:  400 -> 400
    return dict(w1=w1, b1=b1, w21=w21, b21=b21, w22=w22, b22=b22,
                w3=w3, b3=b3, w4=w4, b4=b4)


def vae_forward_ref_f32(x, params, eps):
    """Pure f32 JAX reference matching the torch module exactly."""
    B = x.shape[0]
    xf = x.reshape(B, D_IN)
    h1 = jax.nn.relu(xf @ params["w1"] + params["b1"])
    mu = h1 @ params["w21"] + params["b21"]
    logvar = h1 @ params["w22"] + params["b22"]
    z = mu + eps * jnp.exp(0.5 * logvar)
    h3 = jax.nn.relu(z @ params["w3"] + params["b3"])
    recon = jax.nn.sigmoid(h3 @ params["w4"] + params["b4"])
    return recon, mu, logvar


def vae_forward_ref_bf16(x, prepared, eps):
    """Mirrors the kernel's padded / packed-head / bf16-operand math exactly."""
    B = x.shape[0]
    xf = jnp.pad(x.reshape(B, D_IN), ((0, 0), (0, DP_IN - D_IN))).astype(jnp.bfloat16)
    ep = jnp.pad(eps, ((0, 0), (0, DP_Z - D_Z)))

    def dot(a, w):
        return jnp.dot(a.astype(jnp.bfloat16), w, preferred_element_type=jnp.float32)

    h1 = jax.nn.relu(dot(xf, prepared["w1"]) + prepared["b1"])
    head = dot(h1, prepared["wh"]) + prepared["bh"]
    std = jnp.exp(0.5 * jnp.roll(head, LV_OFF, axis=1))
    z = head + ep * std
    h3 = jax.nn.relu(dot(z, prepared["w3"]) + prepared["b3"])
    recon = jax.nn.sigmoid(dot(h3, prepared["w4"]) + prepared["b4"]).astype(jnp.bfloat16)
    return recon[:, :D_IN], head[:, :D_Z], head[:, LV_OFF:LV_OFF + D_Z]


# --------------------------------------------------------------------------- main


if __name__ == "__main__":
    key = jax.random.PRNGKey(0)
    k_params, k_x, k_eps = jax.random.split(key, 3)

    B = 2
    x = jax.random.normal(k_x, (B, 1, 20, 20), jnp.float32)   # NCHW, flattens to (B, 400)
    params = init_params(k_params)
    eps = jax.random.normal(k_eps, (B, D_Z), jnp.float32)     # ~ torch.randn_like(std)

    prepared = prepare_params(params)
    recon, mu, logvar = jax.block_until_ready(vae_forward(x, prepared, eps))

    assert recon.shape == (B, D_IN) and recon.dtype == jnp.bfloat16
    assert mu.shape == (B, D_Z) and logvar.shape == (B, D_Z)

    # Tight check vs. a reference that mirrors the kernel's bf16/packed math exactly.
    r_m, mu_m, lv_m = vae_forward_ref_bf16(x, prepared, eps)
    assert jnp.allclose(recon.astype(jnp.float32), r_m.astype(jnp.float32), atol=1e-2), \
        float(jnp.max(jnp.abs(recon.astype(jnp.float32) - r_m.astype(jnp.float32))))
    assert jnp.allclose(mu, mu_m, atol=2e-3), float(jnp.max(jnp.abs(mu - mu_m)))
    assert jnp.allclose(logvar, lv_m, atol=2e-3), float(jnp.max(jnp.abs(logvar - lv_m)))

    # Sanity check vs. the pure-f32 torch-equivalent reference (bf16 rounding tolerance).
    r_f, mu_f, lv_f = vae_forward_ref_f32(x, params, eps)
    assert jnp.allclose(recon.astype(jnp.float32), r_f, atol=5e-2)
    assert jnp.allclose(mu, mu_f, atol=5e-2)
    assert jnp.allclose(logvar, lv_f, atol=5e-2)

    print("KERNEL_OK")
</pallas_src>

<mosaic_0001>
module attributes {stable_mosaic.version = 11 : i64} {
  func.func @_vae_kernel(%arg0: i32, %arg1: memref<8x512xbf16, #tpu.memory_space<vmem>>, %arg2: memref<8x128xf32, #tpu.memory_space<vmem>>, %arg3: memref<512x128xbf16, #tpu.memory_space<vmem>>, %arg4: memref<1x128xf32, #tpu.memory_space<vmem>>, %arg5: memref<128x128xbf16, #tpu.memory_space<vmem>>, %arg6: memref<1x128xf32, #tpu.memory_space<vmem>>, %arg7: memref<128x512xbf16, #tpu.memory_space<vmem>>, %arg8: memref<1x512xf32, #tpu.memory_space<vmem>>, %arg9: memref<512x512xbf16, #tpu.memory_space<vmem>>, %arg10: memref<1x512xf32, #tpu.memory_space<vmem>>, %arg11: memref<8x512xbf16, #tpu.memory_space<vmem>>, %arg12: memref<8x128xf32, #tpu.memory_space<vmem>>) attributes {dimension_semantics = [#tpu.dimension_semantics<parallel>], iteration_bounds = array<i64: 1>, scalar_prefetch = 0 : i64, scratch_operands = 0 : i64, tpu.core_type = #tpu.core_type<tc>, window_params = [{transform_indices = @transform_0, window_bounds = array<i64: 8, 512>}, {transform_indices = @transform_1, window_bounds = array<i64: 8, 128>}, {pipeline_mode = #tpu.pipeline_mode<synchronous>, transform_indices = @transform_2, window_bounds = array<i64: 512, 128>}, {pipeline_mode = #tpu.pipeline_mode<synchronous>, transform_indices = @transform_3, window_bounds = array<i64: 1, 128>}, {pipeline_mode = #tpu.pipeline_mode<synchronous>, transform_indices = @transform_4, window_bounds = array<i64: 128, 128>}, {pipeline_mode = #tpu.pipeline_mode<synchronous>, transform_indices = @transform_5, window_bounds = array<i64: 1, 128>}, {pipeline_mode = #tpu.pipeline_mode<synchronous>, transform_indices = @transform_6, window_bounds = array<i64: 128, 512>}, {pipeline_mode = #tpu.pipeline_mode<synchronous>, transform_indices = @transform_7, window_bounds = array<i64: 1, 512>}, {pipeline_mode = #tpu.pipeline_mode<synchronous>, transform_indices = @transform_8, window_bounds = array<i64: 512, 512>}, {pipeline_mode = #tpu.pipeline_mode<synchronous>, transform_indices = @transform_9, window_bounds = array<i64: 1, 512>}, {transform_indices = @transform_10, window_bounds = array<i64: 8, 512>}, {transform_indices = @transform_11, window_bounds = array<i64: 8, 128>}]} {
    %c0 = arith.constant 0 : index
    %c0_0 = arith.constant 0 : index
    %0 = vector.load %arg1[%c0, %c0_0] : memref<8x512xbf16, #tpu.memory_space<vmem>>, vector<8x512xbf16>
    %c0_1 = arith.constant 0 : index
    %c0_2 = arith.constant 0 : index
    %1 = vector.load %arg3[%c0_1, %c0_2] : memref<512x128xbf16, #tpu.memory_space<vmem>>, vector<512x128xbf16>
    %cst = arith.constant dense<0.000000e+00> : vector<8x128xf32>
    %2 = tpu.matmul %0, %1, %cst {dimension_numbers = #tpu.dot_dimension_numbers<[1], [0], [0], [1], [0, 0, 1, 1], [], []>} : vector<8x512xbf16>, vector<512x128xbf16>, vector<8x128xf32> -> vector<8x128xf32>
    %c0_3 = arith.constant 0 : index
    %c0_4 = arith.constant 0 : index
    %3 = vector.load %arg4[%c0_3, %c0_4] : memref<1x128xf32, #tpu.memory_space<vmem>>, vector<1x128xf32>
    %4 = vector.broadcast %3 : vector<1x128xf32> to vector<8x128xf32>
    %5 = arith.addf %2, %4 : vector<8x128xf32>
    %cst_5 = arith.constant 0.000000e+00 : f32
    %6 = vector.broadcast %cst_5 : f32 to vector<8x128xf32>
    %7 = arith.maximumf %5, %6 : vector<8x128xf32>
    %8 = arith.truncf %7 : vector<8x128xf32> to vector<8x128xbf16>
    %c0_6 = arith.constant 0 : index
    %c0_7 = arith.constant 0 : index
    %9 = vector.load %arg5[%c0_6, %c0_7] : memref<128x128xbf16, #tpu.memory_space<vmem>>, vector<128x128xbf16>
    %cst_8 = arith.constant dense<0.000000e+00> : vector<8x128xf32>
    %10 = tpu.matmul %8, %9, %cst_8 {dimension_numbers = #tpu.dot_dimension_numbers<[1], [0], [0], [1], [0, 0, 1, 1], [], []>} : vector<8x128xbf16>, vector<128x128xbf16>, vector<8x128xf32> -> vector<8x128xf32>
    %c0_9 = arith.constant 0 : index
    %c0_10 = arith.constant 0 : index
    %11 = vector.load %arg6[%c0_9, %c0_10] : memref<1x128xf32, #tpu.memory_space<vmem>>, vector<1x128xf32>
    %12 = vector.broadcast %11 : vector<1x128xf32> to vector<8x128xf32>
    %13 = arith.addf %10, %12 : vector<8x128xf32>
    %c64_i32 = arith.constant 64 : i32
    %14 = tpu.dynamic_rotate %13 by %c64_i32 dim 1 : vector<8x128xf32>, i32 -> vector<8x128xf32>
    %cst_11 = arith.constant 5.000000e-01 : f32
    %15 = vector.broadcast %cst_11 : f32 to vector<8x128xf32>
    %16 = arith.mulf %15, %14 : vector<8x128xf32>
    %17 = math.exp %16 : vector<8x128xf32>
    %c0_12 = arith.constant 0 : index
    %c0_13 = arith.constant 0 : index
    %18 = vector.load %arg2[%c0_12, %c0_13] : memref<8x128xf32, #tpu.memory_space<vmem>>, vector<8x128xf32>
    %19 = arith.mulf %18, %17 : vector<8x128xf32>
    %20 = arith.addf %13, %19 : vector<8x128xf32>
    %21 = arith.truncf %20 : vector<8x128xf32> to vector<8x128xbf16>
    %c0_14 = arith.constant 0 : index
    %c0_15 = arith.constant 0 : index
    %22 = vector.load %arg7[%c0_14, %c0_15] : memref<128x512xbf16, #tpu.memory_space<vmem>>, vector<128x512xbf16>
    %cst_16 = arith.constant dense<0.000000e+00> : vector<8x512xf32>
    %23 = tpu.matmul %21, %22, %cst_16 {dimension_numbers = #tpu.dot_dimension_numbers<[1], [0], [0], [1], [0, 0, 1, 1], [], []>} : vector<8x128xbf16>, vector<128x512xbf16>, vector<8x512xf32> -> vector<8x512xf32>
    %c0_17 = arith.constant 0 : index
    %c0_18 = arith.constant 0 : index
    %24 = vector.load %arg8[%c0_17, %c0_18] : memref<1x512xf32, #tpu.memory_space<vmem>>, vector<1x512xf32>
    %25 = vector.broadcast %24 : vector<1x512xf32> to vector<8x512xf32>
    %26 = arith.addf %23, %25 : vector<8x512xf32>
    %cst_19 = arith.constant 0.000000e+00 : f32
    %27 = vector.broadcast %cst_19 : f32 to vector<8x512xf32>
    %28 = arith.maximumf %26, %27 : vector<8x512xf32>
    %29 = arith.truncf %28 : vector<8x512xf32> to vector<8x512xbf16>
    %c0_20 = arith.constant 0 : index
    %c0_21 = arith.constant 0 : index
    %30 = vector.load %arg9[%c0_20, %c0_21] : memref<512x512xbf16, #tpu.memory_space<vmem>>, vector<512x512xbf16>
    %cst_22 = arith.constant dense<0.000000e+00> : vector<8x512xf32>
    %31 = tpu.matmul %29, %30, %cst_22 {dimension_numbers = #tpu.dot_dimension_numbers<[1], [0], [0], [1], [0, 0, 1, 1], [], []>} : vector<8x512xbf16>, vector<512x512xbf16>, vector<8x512xf32> -> vector<8x512xf32>
    %c0_23 = arith.constant 0 : index
    %c0_24 = arith.constant 0 : index
    %32 = vector.load %arg10[%c0_23, %c0_24] : memref<1x512xf32, #tpu.memory_space<vmem>>, vector<1x512xf32>
    %33 = vector.broadcast %32 : vector<1x512xf32> to vector<8x512xf32>
    %34 = arith.addf %31, %33 : vector<8x512xf32>
    %35 = arith.negf %34 : vector<8x512xf32>
    %36 = math.exp %35 : vector<8x512xf32>
    %cst_25 = arith.constant 1.000000e+00 : f32
    %37 = vector.broadcast %cst_25 : f32 to vector<8x512xf32>
    %38 = arith.addf %37, %36 : vector<8x512xf32>
    %39 = arith.divf %37, %38 : vector<8x512xf32>
    %40 = arith.truncf %39 : vector<8x512xf32> to vector<8x512xbf16>
    %c0_26 = arith.constant 0 : index
    %c0_27 = arith.constant 0 : index
    %41 = vector.load %arg11[%c0_26, %c0_27] : memref<8x512xbf16, #tpu.memory_space<vmem>>, vector<8x512xbf16>
    tpu.vector_store %arg11[%c0_26, %c0_27], %40 {strides = array<i32>} : memref<8x512xbf16, #tpu.memory_space<vmem>>, vector<8x512xbf16>,
    %c0_28 = arith.constant 0 : index
    %c0_29 = arith.constant 0 : index
    %42 = vector.load %arg12[%c0_28, %c0_29] : memref<8x128xf32, #tpu.memory_space<vmem>>, vector<8x128xf32>
    tpu.vector_store %arg12[%c0_28, %c0_29], %13 {strides = array<i32>} : memref<8x128xf32, #tpu.memory_space<vmem>>, vector<8x128xf32>,
    return
  }
  func.func @transform_0(%arg0: i32) -> (i32, i32) {
    %c0_i32 = arith.constant 0 : i32
    %c0_i32_0 = arith.constant 0 : i32
    return %arg0, %c0_i32 : i32, i32
  }
  func.func @transform_1(%arg0: i32) -> (i32, i32) {
    %c0_i32 = arith.constant 0 : i32
    %c0_i32_0 = arith.constant 0 : i32
    return %arg0, %c0_i32 : i32, i32
  }
  func.func @transform_2(%arg0: i32) -> (i32, i32) {
    %c0_i32 = arith.constant 0 : i32
    %c0_i32_0 = arith.constant 0 : i32
    %c0_i32_1 = arith.constant 0 : i32
    return %c0_i32, %c0_i32_0 : i32, i32
  }
  func.func @transform_3(%arg0: i32) -> (i32, i32) {
    %c0_i32 = arith.constant 0 : i32
    %c0_i32_0 = arith.constant 0 : i32
    %c0_i32_1 = arith.constant 0 : i32
    return %c0_i32, %c0_i32_0 : i32, i32
  }
  func.func @transform_4(%arg0: i32) -> (i32, i32) {
    %c0_i32 = arith.constant 0 : i32
    %c0_i32_0 = arith.constant 0 : i32
    %c0_i32_1 = arith.constant 0 : i32
    return %c0_i32, %c0_i32_0 : i32, i32
  }
  func.func @transform_5(%arg0: i32) -> (i32, i32) {
    %c0_i32 = arith.constant 0 : i32
    %c0_i32_0 = arith.constant 0 : i32
    %c0_i32_1 = arith.constant 0 : i32
    return %c0_i32, %c0_i32_0 : i32, i32
  }
  func.func @transform_6(%arg0: i32) -> (i32, i32) {
    %c0_i32 = arith.constant 0 : i32
    %c0_i32_0 = arith.constant 0 : i32
    %c0_i32_1 = arith.constant 0 : i32
    return %c0_i32, %c0_i32_0 : i32, i32
  }
  func.func @transform_7(%arg0: i32) -> (i32, i32) {
    %c0_i32 = arith.constant 0 : i32
    %c0_i32_0 = arith.constant 0 : i32
    %c0_i32_1 = arith.constant 0 : i32
    return %c0_i32, %c0_i32_0 : i32, i32
  }
  func.func @transform_8(%arg0: i32) -> (i32, i32) {
    %c0_i32 = arith.constant 0 : i32
    %c0_i32_0 = arith.constant 0 : i32
    %c0_i32_1 = arith.constant 0 : i32
    return %c0_i32, %c0_i32_0 : i32, i32
  }
  func.func @transform_9(%arg0: i32) -> (i32, i32) {
    %c0_i32 = arith.constant 0 : i32
    %c0_i32_0 = arith.constant 0 : i32
    %c0_i32_1 = arith.constant 0 : i32
    return %c0_i32, %c0_i32_0 : i32, i32
  }
  func.func @transform_10(%arg0: i32) -> (i32, i32) {
    %c0_i32 = arith.constant 0 : i32
    %c0_i32_0 = arith.constant 0 : i32
    return %arg0, %c0_i32 : i32, i32
  }
  func.func @transform_11(%arg0: i32) -> (i32, i32) {
    %c0_i32 = arith.constant 0 : i32
    %c0_i32_0 = arith.constant 0 : i32
    return %arg0, %c0_i32 : i32, i32
  }
}

</mosaic_0001>

<bundles_post_ra>
// kernel: vae_forward.1
= control target key start
LH: loop header
LB: loop body
LE: loop exit
PB: predicated region body
PF: predicated region fallthrough
CT: control target
= control target key end

     0   :  { %17 = vsyncpa [#allocation3], 0  ;;  %s2748_s0 = inlined_call_operand.vmem [shape: bf16[8,512], index: 0, kind: input, shape index: {}]   ;;  %s2749_s1 = inlined_call_operand.vmem [shape: f32[8,128], index: 1, kind: input, shape index: {}]   ;;  %s2750_s2 = inlined_call_operand.hbm [shape: bf16[512,128], index: 2, kind: input, shape index: {}]   ;;  %s2751_s3 = inlined_call_operand.vmem [shape: f32[1,128], index: 3, kind: input, shape index: {}]   ;;  %s2752_s4 = inlined_call_operand.vmem [shape: bf16[128,128], index: 4, kind: input, shape index: {}]   ;;  %s2753_s5 = inlined_call_operand.vmem [shape: f32[1,128], index: 5, kind: input, shape index: {}]   ;;  %s2754_s6 = inlined_call_operand.hbm [shape: bf16[128,512], index: 6, kind: input, shape index: {}]   ;;  %s2755_s7 = inlined_call_operand.vmem [shape: f32[1,512], index: 7, kind: input, shape index: {}]   ;;  %s2756_s8 = inlined_call_operand.hbm [shape: bf16[512,512], index: 8, kind: input, shape index: {}]   ;;  %s2757_s9 = inlined_call_operand.vmem [shape: f32[1,512], index: 9, kind: input, shape index: {}]   ;;  %s2758_s10 = inlined_call_operand.vmem [shape: bf16[8,512], index: 10, kind: output, shape index: {0}]   ;;  %s2759_s11 = inlined_call_operand.vmem [shape: f32[8,128], index: 11, kind: output, shape index: {1}]  }
   0x1   :  { %18 = vsyncpa [#allocation5], 0  ;;  %s2552_s17 = smov [#allocation4]   ;;  %s2482_s21 = scalar_lea.hbm %s2754_s6, 4096 }
   0x2   :  { %s46_s18 = sshll.u32 %s2552_s17, 4  ;;  %p2483_p0 = scmp.ne.s32.totalorder %s2754_s6, %s2482_s21  ;;  %s47_s18 = int_to_ptr.vmem [resolvable:$true] %s46_s18 }
   0x3   :  { %p2486_p1 = scmp.lt.u32.totalorder %s2482_s21, %s2754_s6 }
   0x5   :  { %p2488_p2 = pnand %p2486_p1, %p2483_p0 }
   0x7   :  { %2491 = shalt.err (!%p2488_p2)
}
   0x8   :  { %s2492_s26 = scalar_lea.vmem %s47_s18, 4096  ;;  %p2497_p4 = scmp.lt.s32.totalorder %s47_s18, %s47_s18 }
   0x9   :  { %p2493_p3 = scmp.ne.s32.totalorder %s47_s18, %s2492_s26  ;;  %p2498_p5 = scmp.lt.s32.totalorder %s2492_s26, %s2492_s26 }
   0xb   :  { %p2499_p6 = por %p2498_p5, %p2497_p4 }
   0xd   :  { %p2500_p7 = pnand %p2499_p6, %p2493_p3 }
   0xf   :  { %2503 = shalt.err (!%p2500_p7)
}
  0x10   :  { %s2553_s27 = smov 256   ;;  %s2554_s28 = smov 16  }
  0x11   :  { %52 = dma.hbm_to_vmem [thread:$0]  %s2754_s6, 4096, %s47_s18, [#allocation5], %s2553_s27, %s2553_s27, %s2554_s28  }
  0x12   :  { %s2555_s12 = smov [#allocation2]   ;;  %s2504_s16 = scalar_lea.hbm %s2750_s2, 4096 }
  0x13   :  { %s28_s13 = sshll.u32 %s2555_s12, 4  ;;  %p2505_p8 = scmp.ne.s32.totalorder %s2750_s2, %s2504_s16  ;;  %s29_s13 = int_to_ptr.vmem [resolvable:$true] %s28_s13 }
  0x14   :  { %p2508_p9 = scmp.lt.u32.totalorder %s2504_s16, %s2750_s2 }
  0x16   :  { %p2510_p10 = pnand %p2508_p9, %p2505_p8 }
  0x18   :  { %2513 = shalt.err (!%p2510_p10)
}
  0x19   :  { %s2514_s22 = scalar_lea.vmem %s29_s13, 4096  ;;  %p2519_p12 = scmp.lt.s32.totalorder %s29_s13, %s29_s13 }
  0x1a   :  { %p2515_p11 = scmp.ne.s32.totalorder %s29_s13, %s2514_s22  ;;  %p2520_p13 = scmp.lt.s32.totalorder %s2514_s22, %s2514_s22 }
  0x1c   :  { %p2521_p0 = por %p2520_p13, %p2519_p12 }
  0x1e   :  { %p2522_p1 = pnand %p2521_p0, %p2515_p11 }
  0x20   :  { %2525 = shalt.err (!%p2522_p1)
}
  0x21   :  { %s2556_s6 = smov 64   ;;  %s2557_s18 = smov 4  }
  0x22   :  { %34 = dma.hbm_to_vmem [thread:$0]  %s2750_s2, 4096, %s29_s13, [#allocation3], %s2556_s6, %s2556_s6, %s2557_s18  }
  0x23   :  { %s2558_s25 = smov [#allocation6]   ;;  %s2526_s12 = scalar_lea.hbm %s2756_s8, 16384 }
  0x24   :  { %s60_s26 = sshll.u32 %s2558_s25, 4  ;;  %p2527_p2 = scmp.ne.s32.totalorder %s2756_s8, %s2526_s12  ;;  %s61_s26 = int_to_ptr.vmem [resolvable:$true] %s60_s26 }
  0x25   :  { %p2530_p3 = scmp.lt.u32.totalorder %s2526_s12, %s2756_s8 }
  0x27   :  { %p2532_p4 = pnand %p2530_p3, %p2527_p2 }
  0x29   :  { %2535 = shalt.err (!%p2532_p4)
}
  0x2a   :  { %s2536_s19 = scalar_lea.vmem %s61_s26, 16384  ;;  %p2541_p6 = scmp.lt.s32.totalorder %s61_s26, %s61_s26 }
  0x2b   :  { %p2537_p5 = scmp.ne.s32.totalorder %s61_s26, %s2536_s19  ;;  %p2542_p7 = scmp.lt.s32.totalorder %s2536_s19, %s2536_s19 }
  0x2d   :  { %p2543_p8 = por %p2542_p7, %p2541_p6 }
  0x2f   :  { %p2544_p9 = pnand %p2543_p8, %p2537_p5 }
  0x31   :  { %2547 = shalt.err (!%p2544_p9)
}
  0x32   :  { %66 = dma.hbm_to_vmem [thread:$0]  %s2756_s8, 16384, %s61_s26, [#allocation5], %s2553_s27, %s2553_s27, %s2554_s28  }
  0x33   :  { %2548 = dma.done.wait [#allocation3], 4096  }
  0x34   :  { %2549 = vsyncadd [#allocation3], 4294963200 }
  0x35   :  { %2550 = dma.done.wait [#allocation5], 20480  }
  0x36   :  { %2551 = vsyncadd [#allocation5], 4294946816  ;;  %v2180_v0 = vld [vmem:[#allocation2 + $0x40] sm:$0xff]   ;;  %v2184_v4 = vld [vmem:[#allocation2 + $0x48] sm:$0xff]   ;;  %v2559_v39 = vmov 0.0   ;;  %vm2560_vm0 = vmmov 0  }
  0x37   :  { %v2181_v1 = vld [vmem:[#allocation2 + $0xc0] sm:$0xff]   ;;  %2085 = vmatprep.subr.bf16.mxu0 %v2180_v0  ;;  %v2185_v5 = vld [vmem:[#allocation2 + $0xc8] sm:$0xff]   ;;  %v2188_v8 = vld [vmem:[#allocation2 + $0x50] sm:$0xff]  }
  0x38   :  { %v2182_v2 = vld [vmem:[#allocation2] sm:$0xff]   ;;  %2107 = vmatprep.subr.bf16.mxu1 %v2181_v1  ;;  %v2186_v6 = vld [vmem:[#allocation2 + $0x8] sm:$0xff]   ;;  %v2189_v9 = vld [vmem:[#allocation2 + $0xd0] sm:$0xff]  }
  0x39   :  { %v2183_v3 = vld [vmem:[#allocation2 + $0x80] sm:$0xff]   ;;  %2086 = vmatpush3.bf16.msra.mxu0 %v2182_v2  ;;  %v2187_v7 = vld [vmem:[#allocation2 + $0x88] sm:$0xff]   ;;  %v2190_v10 = vld [vmem:[#allocation2 + $0x10] sm:$0xff]  }
  0x3a   :  { %2108 = vmatpush3.bf16.msra.mxu1 %v2183_v3  ;;  %2087 = vmatprep.subr.bf16.mxu0 %v2184_v4  ;;  %v2191_v11 = vld [vmem:[#allocation2 + $0x90] sm:$0xff]   ;;  %v2192_v12 = vld [vmem:[#allocation2 + $0x58] sm:$0xff]   ;;  %v2196_v16 = vld [vmem:[#allocation2 + $0x60] sm:$0xff]  }
  0x3b   :  { %2109 = vmatprep.subr.bf16.mxu1 %v2185_v5  ;;  %v2193_v13 = vld [vmem:[#allocation2 + $0xd8] sm:$0xff]   ;;  %v2197_v17 = vld [vmem:[#allocation2 + $0xe0] sm:$0xff]   ;;  %v2200_v20 = vld [vmem:[#allocation2 + $0x68] sm:$0xff]  }
  0x3c   :  { %v2194_v14 = vld [vmem:[#allocation2 + $0x18] sm:$0xff]   ;;  %v2198_v18 = vld [vmem:[#allocation2 + $0x20] sm:$0xff]   ;;  %v2201_v21 = vld [vmem:[#allocation2 + $0xe8] sm:$0xff]  }
  0x3d   :  { %2088 = vmatpush3.bf16.msra.mxu0 %v2186_v6  ;;  %v2195_v15 = vld [vmem:[#allocation2 + $0x98] sm:$0xff]   ;;  %v2199_v19 = vld [vmem:[#allocation2 + $0xa0] sm:$0xff]   ;;  %v2202_v22 = vld [vmem:[#allocation2 + $0x28] sm:$0xff]  }
  0x3e   :  { %2110 = vmatpush3.bf16.msra.mxu1 %v2187_v7  ;;  %2089 = vmatprep.subr.bf16.mxu0 %v2188_v8  ;;  %v2203_v23 = vld [vmem:[#allocation2 + $0xa8] sm:$0xff]   ;;  %v2204_v24 = vld [vmem:[#allocation2 + $0x70] sm:$0xff]   ;;  %v2208_v28 = vld [vmem:[#allocation2 + $0x78] sm:$0xff]  }
  0x3f   :  { %2111 = vmatprep.subr.bf16.mxu1 %v2189_v9  ;;  %v2205_v25 = vld [vmem:[#allocation2 + $0xf0] sm:$0xff]   ;;  %v2209_v29 = vld [vmem:[#allocation2 + $0xf8] sm:$0xff]   ;;  %v79_v32 = vld [vmem:[%s2748_s0] sm:$0xff] }
  0x40   :  { %v2206_v26 = vld [vmem:[#allocation2 + $0x30] sm:$0xff]   ;;  %v2210_v30 = vld [vmem:[#allocation2 + $0x38] sm:$0xff]   ;;  %v80_v33 = vld [vmem:[%s2748_s0 + $0x8] sm:$0xff]  ;;  %v1872_v34 = vcombine.low %v79_v32, %v79_v32  ;;  %v1873_v35 = vcombine.high %v79_v32, %v79_v32 }
  0x41   :  { %2090 = vmatpush3.bf16.msra.mxu0 %v2190_v10  ;;  %v2207_v27 = vld [vmem:[#allocation2 + $0xb0] sm:$0xff]   ;;  %v2211_v31 = vld [vmem:[#allocation2 + $0xb8] sm:$0xff]   ;;  %v1874_v36 = vcombine.low %v80_v33, %v80_v33  ;;  %v1875_v37 = vcombine.high %v80_v33, %v80_v33  ;;  %v2216_v38 = vld [vmem:[%s2752_s4] sm:$0xff]  }
  0x42   :  { %2112 = vmatpush3.bf16.msra.mxu1 %v2191_v11  ;;  %2091 = vmatprep.subr.bf16.mxu0 %v2192_v12  ;;  %v2217_v40 = vld [vmem:[%s2752_s4 + $0x8] sm:$0xff]   ;;  %v2218_v41 = vld [vmem:[%s2752_s4 + $0x10] sm:$0xff]   ;;  %v2219_v42 = vld [vmem:[%s2752_s4 + $0x18] sm:$0xff]  }
  0x43   :  { %2113 = vmatprep.subr.bf16.mxu1 %v2193_v13  ;;  %390 = vmatprep.mubr.bf16.mxu0 %v1873_v35  ;;  %v2220_v43 = vld [vmem:[%s2752_s4 + $0x20] sm:$0xff]   ;;  %v2221_v44 = vld [vmem:[%s2752_s4 + $0x28] sm:$0xff]   ;;  %v2222_v45 = vld [vmem:[%s2752_s4 + $0x30] sm:$0xff]  }
  0x44   :  { %430 = vmatprep.mubr.bf16.mxu1 %v1875_v37  ;;  %v2223_v46 = vld [vmem:[%s2752_s4 + $0x38] sm:$0xff]   ;;  %v1871_v49 = vld [vmem:[%s2751_s3] ss:$0 sm:$0xff]  ;;  %v2226_v63 = vld [vmem:[#allocation4 + $0x4] ss:$16 sps:$4 sm:$0xff]  }
  0x45   :  { %2092 = vmatpush3.bf16.msra.mxu0 %v2194_v14  ;;  %v2224_v62 = vld [vmem:[#allocation4] ss:$16 sps:$4 sm:$0xff]   ;;  %v2227_v0 = vld [vmem:[#allocation4 + $0x8] ss:$16 sps:$4 sm:$0xff]   ;;  %v2229_v1 = vld [vmem:[#allocation4 + $0xc] ss:$16 sps:$4 sm:$0xff]  }
  0x46   :  { %2114 = vmatpush3.bf16.msra.mxu1 %v2195_v15  ;;  %2093 = vmatprep.subr.bf16.mxu0 %v2196_v16  ;;  %v2232_v2 = vld [vmem:[#allocation4 + $0x24] ss:$16 sps:$4 sm:$0xff]   ;;  %v2235_v3 = vld [vmem:[#allocation4 + $0x2c] ss:$16 sps:$4 sm:$0xff]   ;;  %v2230_v4 = vld [vmem:[#allocation4 + $0x20] ss:$16 sps:$4 sm:$0xff]  }
  0x47   :  { %2115 = vmatprep.subr.bf16.mxu1 %v2197_v17  ;;  %v2233_v5 = vld [vmem:[#allocation4 + $0x28] ss:$16 sps:$4 sm:$0xff]   ;;  %v2238_v6 = vld [vmem:[#allocation4 + $0x44] ss:$16 sps:$4 sm:$0xff]   ;;  %v2241_v7 = vld [vmem:[#allocation4 + $0x4c] ss:$16 sps:$4 sm:$0xff]  }
  0x48   :  { %v2236_v8 = vld [vmem:[#allocation4 + $0x40] ss:$16 sps:$4 sm:$0xff]   ;;  %v2239_v9 = vld [vmem:[#allocation4 + $0x48] ss:$16 sps:$4 sm:$0xff]   ;;  %v2244_v10 = vld [vmem:[#allocation4 + $0x64] ss:$16 sps:$4 sm:$0xff]  }
  0x49   :  { %2094 = vmatpush3.bf16.msra.mxu0 %v2198_v18  ;;  %v2247_v11 = vld [vmem:[#allocation4 + $0x6c] ss:$16 sps:$4 sm:$0xff]   ;;  %v2242_v12 = vld [vmem:[#allocation4 + $0x60] ss:$16 sps:$4 sm:$0xff]   ;;  %v2245_v13 = vld [vmem:[#allocation4 + $0x68] ss:$16 sps:$4 sm:$0xff]  }
  0x4a   :  { %2116 = vmatpush3.bf16.msra.mxu1 %v2199_v19  ;;  %2095 = vmatprep.subr.bf16.mxu0 %v2200_v20  ;;  %v2250_v14 = vld [vmem:[#allocation4 + $0x84] ss:$16 sps:$4 sm:$0xff]   ;;  %v2253_v15 = vld [vmem:[#allocation4 + $0x8c] ss:$16 sps:$4 sm:$0xff]   ;;  %v2248_v16 = vld [vmem:[#allocation4 + $0x80] ss:$16 sps:$4 sm:$0xff]  }
  0x4b   :  { %2117 = vmatprep.subr.bf16.mxu1 %v2201_v21  ;;  %v2251_v17 = vld [vmem:[#allocation4 + $0x88] ss:$16 sps:$4 sm:$0xff]   ;;  %v2256_v18 = vld [vmem:[#allocation4 + $0xa4] ss:$16 sps:$4 sm:$0xff]   ;;  %v2259_v19 = vld [vmem:[#allocation4 + $0xac] ss:$16 sps:$4 sm:$0xff]  }
  0x4c   :  { %v2254_v20 = vld [vmem:[#allocation4 + $0xa0] ss:$16 sps:$4 sm:$0xff]   ;;  %v2257_v21 = vld [vmem:[#allocation4 + $0xa8] ss:$16 sps:$4 sm:$0xff]   ;;  %v2271_v32 = vld [vmem:[#allocation4 + $0xec] ss:$16 sps:$4 sm:$0xff]  }
  0x4d   :  { %2096 = vmatpush3.bf16.msra.mxu0 %v2202_v22  ;;  %v2262_v22 = vld [vmem:[#allocation4 + $0xc4] ss:$16 sps:$4 sm:$0xff]   ;;  %v2266_v35 = vld [vmem:[#allocation4 + $0xe0] ss:$16 sps:$4 sm:$0xff]  }
  0x4e   :  { %2118 = vmatpush3.bf16.msra.mxu1 %v2203_v23  ;;  %2097 = vmatprep.subr.bf16.mxu0 %v2204_v24  ;;  %v2265_v23 = vld [vmem:[#allocation4 + $0xcc] ss:$16 sps:$4 sm:$0xff]   ;;  %v1908_v24 = vld [vmem:[%s2753_s5] ss:$0 sm:$0xff]  ;;  %v2274_v37 = vld [vmem:[#allocation6 + $0x4] ss:$16 sps:$4 sm:$0xff]  }
  0x4f   :  { %2119 = vmatprep.subr.bf16.mxu1 %v2205_v25  ;;  %v2561_v25 = vmov 0  }
  0x51   :  { %2098 = vmatpush3.bf16.msra.mxu0 %v2206_v26 }
  0x52   :  { %2120 = vmatpush3.bf16.msra.mxu1 %v2207_v27  ;;  %2099 = vmatprep.subr.bf16.mxu0 %v2208_v28  ;;  %v2260_v27 = vld [vmem:[#allocation4 + $0xc0] ss:$16 sps:$4 sm:$0xff]   ;;  %v2263_v28 = vld [vmem:[#allocation4 + $0xc8] ss:$16 sps:$4 sm:$0xff]  }
  0x53   :  { %2121 = vmatprep.subr.bf16.mxu1 %v2209_v29 }
  0x55   :  { %2100 = vmatpush3.bf16.msra.mxu0 %v2210_v30 }
  0x56   :  { %2122 = vmatpush3.bf16.msra.mxu1 %v2211_v31  ;;  %2138 = vmatprep.subr.bf16.mxu0 %v2559_v39  ;;  %v2268_v31 = vld [vmem:[#allocation4 + $0xe4] ss:$16 sps:$4 sm:$0xff]  }
  0x57   :  { %774 = vmatprep.subr.bf16.mxu1 %v2226_v63  ;;  %v2296_v63 = vld [vmem:[#allocation6 + $0x80] ss:$16 sps:$4 sm:$0xff]  }
  0x58   :  { %391 = vmatmul.mubr.bf16.vlgmr.msra.gmra.mrb[0].mxu0 %v1872_v34 }
  0x59   :  { %431 = vmatmul.mubr.bf16.vlgmr.msra.gmra.mrb[0].mxu1 %v1874_v36  ;;  %2139 = vmatpush3.bf16.msra.mxu0 %v2216_v38  ;;  %v2269_v36 = vld [vmem:[#allocation4 + $0xe8] ss:$16 sps:$4 sm:$0xff]   ;;  %v2277_v38 = vld [vmem:[#allocation6 + $0xc] ss:$16 sps:$4 sm:$0xff]  }
  0x5a   :  { %2140 = vmatprep.subr.bf16.mxu0 %v2559_v39  ;;  %2154 = vmatprep.mubr.msk.bf16.mxu0 %vm2560_vm0, %v2559_v39 }
  0x5b   :  { %775 = vmatpush1.bf16.msra.mxu1 %v2224_v62  ;;  %806 = vmatprep.mubr.bf16.mxu1 %v2561_v25  ;;  %v2301_v62 = vld [vmem:[#allocation6 + $0x8c] ss:$16 sps:$4 sm:$0xff]  }
  0x5c   :  { %776 = vmatprep.subr.bf16.mxu1 %v2232_v2  ;;  %v2307_v2 = vld [vmem:[#allocation6 + $0xac] ss:$16 sps:$4 sm:$0xff]  }
  0x5d   :  { %2141 = vmatpush3.bf16.msra.mxu0 %v2217_v40 }
  0x5e   :  { %2142 = vmatprep.subr.bf16.mxu0 %v2559_v39 }
  0x5f   :  { %777 = vmatpush1.bf16.msra.mxu1 %v2230_v4  ;;  %v2305_v4 = vld [vmem:[#allocation6 + $0xa8] ss:$16 sps:$4 sm:$0xff]  }
  0x60   :  { %778 = vmatprep.subr.bf16.mxu1 %v2238_v6  ;;  %v2313_v6 = vld [vmem:[#allocation6 + $0xcc] ss:$16 sps:$4 sm:$0xff]  }
  0x61   :  { %2143 = vmatpush3.bf16.msra.mxu0 %v2218_v41 }
  0x62   :  { %2144 = vmatprep.subr.bf16.mxu0 %v2559_v39 }
  0x63   :  { %779 = vmatpush1.bf16.msra.mxu1 %v2236_v8  ;;  %v2311_v8 = vld [vmem:[#allocation6 + $0xc8] ss:$16 sps:$4 sm:$0xff]  }
  0x64   :  { %780 = vmatprep.subr.bf16.mxu1 %v2244_v10  ;;  %v2319_v10 = vld [vmem:[#allocation6 + $0xec] ss:$16 sps:$4 sm:$0xff]  }
  0x65   :  { %2145 = vmatpush3.bf16.msra.mxu0 %v2219_v42  ;;  %v556_v42 = vld [vmem:[%s2749_s1] sm:$0xff] }
  0x66   :  { %2146 = vmatprep.subr.bf16.mxu0 %v2559_v39 }
  0x67   :  { %781 = vmatpush1.bf16.msra.mxu1 %v2242_v12  ;;  %v2317_v12 = vld [vmem:[#allocation6 + $0xe8] ss:$16 sps:$4 sm:$0xff]  }
  0x68   :  { %782 = vmatprep.subr.bf16.mxu1 %v2250_v14  ;;  %v2325_v14 = vld [vmem:[#allocation6 + $0x10c] ss:$16 sps:$4 sm:$0xff]  }
  0x69   :  { %2147 = vmatpush3.bf16.msra.mxu0 %v2220_v43 }
  0x6a   :  { %2148 = vmatprep.subr.bf16.mxu0 %v2559_v39 }
  0x6b   :  { %783 = vmatpush1.bf16.msra.mxu1 %v2248_v16  ;;  %v2323_v16 = vld [vmem:[#allocation6 + $0x108] ss:$16 sps:$4 sm:$0xff]  }
  0x6c   :  { %784 = vmatprep.subr.bf16.mxu1 %v2256_v18  ;;  %v2331_v18 = vld [vmem:[#allocation6 + $0x12c] ss:$16 sps:$4 sm:$0xff]  }
  0x6d   :  { %2149 = vmatpush3.bf16.msra.mxu0 %v2221_v44 }
  0x6e   :  { %2150 = vmatprep.subr.bf16.mxu0 %v2559_v39 }
  0x6f   :  { %785 = vmatpush1.bf16.msra.mxu1 %v2254_v20  ;;  %v2329_v20 = vld [vmem:[#allocation6 + $0x128] ss:$16 sps:$4 sm:$0xff]  }
  0x70   :  { %786 = vmatprep.subr.bf16.mxu1 %v2262_v22  ;;  %v2337_v22 = vld [vmem:[#allocation6 + $0x14c] ss:$16 sps:$4 sm:$0xff]  }
  0x71   :  { %2151 = vmatpush3.bf16.msra.mxu0 %v2222_v45 }
  0x72   :  { %2152 = vmatprep.subr.bf16.mxu0 %v2559_v39 }
  0x73   :  { %787 = vmatpush1.bf16.msra.mxu1 %v2260_v27  ;;  %v2338_v27 = vld [vmem:[#allocation6 + $0x160] ss:$16 sps:$4 sm:$0xff]  }
  0x74   :  { %788 = vmatprep.subr.bf16.mxu1 %v2268_v31  ;;  %v2344_v31 = vld [vmem:[#allocation6 + $0x180] ss:$16 sps:$4 sm:$0xff]  }
  0x75   :  { %2153 = vmatpush3.bf16.msra.mxu0 %v2223_v46  ;;  %v2272_v46 = vld [vmem:[#allocation6] ss:$16 sps:$4 sm:$0xff]  }
  0x76   :  { %815 = vmatprep.subr.bf16.mxu0 %v2229_v1  ;;  %v2304_v1 = vld [vmem:[#allocation6 + $0xa4] ss:$16 sps:$4 sm:$0xff]  }
  0x77   :  { %789 = vmatpush1.bf16.msra.mxu1 %v2266_v35  ;;  %v2350_v35 = vld [vmem:[#allocation6 + $0x1a0] ss:$16 sps:$4 sm:$0xff]  }
  0x78   :  { %1654 = vmatprep.subr.bf16.mxu1 %v2274_v37  ;;  %v2358_v37 = vld [vmem:[#allocation6 + $0x1c4] ss:$16 sps:$4 sm:$0xff]  }
 0x12b   :  { %v2101_v47 = vpop.f32.mrb[0].mxu0 }
 0x12c   :  { %v2123_v48 = vpop.f32.mrb[0].mxu1  ;;  %v2102_v50 = vpop.f32.mrb[1].mxu0 }
 0x12d   :  { %v2124_v51 = vpop.f32.mrb[1].mxu1  ;;  %v2103_v52 = vadd.f32 %v2102_v50, %v2101_v47  ;;  %v2104_v54 = vpop.f32.mrb[2].mxu0  ;;  %v2275_v47 = vld [vmem:[#allocation6 + $0x8] ss:$16 sps:$4 sm:$0xff]   ;;  %v2283_v50 = vld [vmem:[#allocation6 + $0x2c] ss:$16 sps:$4 sm:$0xff]  }
 0x12e   :  { %v2125_v53 = vadd.f32 %v2124_v51, %v2123_v48  ;;  %v2126_v55 = vpop.f32.mrb[2].mxu1  ;;  %v2105_v56 = vpop.f32.mrb[3].mxu0  ;;  %v2278_v51 = vld [vmem:[#allocation6 + $0x20] ss:$16 sps:$4 sm:$0xff]   ;;  %v2289_v54 = vld [vmem:[#allocation6 + $0x4c] ss:$16 sps:$4 sm:$0xff]  }
 0x12f   :  { %v2127_v57 = vpop.f32.mrb[3].mxu1  ;;  %v393_v58 = vadd.f32 %v2103_v52, %v1871_v49  ;;  %v2280_v49 = vld [vmem:[#allocation6 + $0x24] ss:$16 sps:$4 sm:$0xff]   ;;  %v2281_v52 = vld [vmem:[#allocation6 + $0x28] ss:$16 sps:$4 sm:$0xff]  }
 0x130   :  { %v2284_v55 = vld [vmem:[#allocation6 + $0x40] ss:$16 sps:$4 sm:$0xff]   ;;  %v2287_v56 = vld [vmem:[#allocation6 + $0x48] ss:$16 sps:$4 sm:$0xff]   ;;  %v2292_v57 = vld [vmem:[#allocation6 + $0x64] ss:$16 sps:$4 sm:$0xff]  }
 0x131   :  { %v433_v59 = vadd.f32 %v2125_v53, %v393_v58  ;;  %v2286_v53 = vld [vmem:[#allocation6 + $0x44] ss:$16 sps:$4 sm:$0xff]   ;;  %v2295_v58 = vld [vmem:[#allocation6 + $0x6c] ss:$16 sps:$4 sm:$0xff]  }
 0x133   :  { %v438_v60 = vmax.f32 %v433_v59, 0.0  ;;  %v2290_v59 = vld [vmem:[#allocation6 + $0x60] ss:$16 sps:$4 sm:$0xff]  }
 0x135   :  { %v439_v61 = vpack.c.bf16 %v438_v60, %v438_v60  ;;  %v2293_v60 = vld [vmem:[#allocation6 + $0x68] ss:$16 sps:$4 sm:$0xff]  }
 0x137   :  { %2155 = vmatmul.mubr.bf16.vlgmr.msra.gmra.mrb[4].mxu0 %v439_v61  ;;  %v2298_v61 = vld [vmem:[#allocation6 + $0x84] ss:$16 sps:$4 sm:$0xff]  }
 0x138   :  { %816 = vmatpush1.bf16.msra.mxu0 %v2227_v0  ;;  %847 = vmatprep.mubr.bf16.mxu0 %v2561_v25  ;;  %v2299_v0 = vld [vmem:[#allocation6 + $0x88] ss:$16 sps:$4 sm:$0xff]   ;;  %v2340_v25 = vld [vmem:[#allocation6 + $0x164] ss:$16 sps:$4 sm:$0xff]  }
 0x139   :  { %817 = vmatprep.subr.bf16.mxu0 %v2235_v3  ;;  %v2302_v3 = vld [vmem:[#allocation6 + $0xa0] ss:$16 sps:$4 sm:$0xff]  }
 0x13c   :  { %818 = vmatpush1.bf16.msra.mxu0 %v2233_v5  ;;  %v2310_v5 = vld [vmem:[#allocation6 + $0xc4] ss:$16 sps:$4 sm:$0xff]  }
 0x13d   :  { %819 = vmatprep.subr.bf16.mxu0 %v2241_v7  ;;  %v2308_v7 = vld [vmem:[#allocation6 + $0xc0] ss:$16 sps:$4 sm:$0xff]  }
 0x140   :  { %820 = vmatpush1.bf16.msra.mxu0 %v2239_v9  ;;  %v2316_v9 = vld [vmem:[#allocation6 + $0xe4] ss:$16 sps:$4 sm:$0xff]  }
 0x141   :  { %821 = vmatprep.subr.bf16.mxu0 %v2247_v11  ;;  %v2314_v11 = vld [vmem:[#allocation6 + $0xe0] ss:$16 sps:$4 sm:$0xff]  }
 0x144   :  { %822 = vmatpush1.bf16.msra.mxu0 %v2245_v13  ;;  %v2322_v13 = vld [vmem:[#allocation6 + $0x104] ss:$16 sps:$4 sm:$0xff]  }
 0x145   :  { %823 = vmatprep.subr.bf16.mxu0 %v2253_v15  ;;  %v2320_v15 = vld [vmem:[#allocation6 + $0x100] ss:$16 sps:$4 sm:$0xff]  }
 0x148   :  { %824 = vmatpush1.bf16.msra.mxu0 %v2251_v17  ;;  %v2328_v17 = vld [vmem:[#allocation6 + $0x124] ss:$16 sps:$4 sm:$0xff]  }
 0x149   :  { %825 = vmatprep.subr.bf16.mxu0 %v2259_v19  ;;  %v2326_v19 = vld [vmem:[#allocation6 + $0x120] ss:$16 sps:$4 sm:$0xff]  }
 0x14c   :  { %826 = vmatpush1.bf16.msra.mxu0 %v2257_v21  ;;  %v2334_v21 = vld [vmem:[#allocation6 + $0x144] ss:$16 sps:$4 sm:$0xff]  }
 0x14d   :  { %827 = vmatprep.subr.bf16.mxu0 %v2265_v23  ;;  %v2332_v23 = vld [vmem:[#allocation6 + $0x140] ss:$16 sps:$4 sm:$0xff]  }
 0x150   :  { %828 = vmatpush1.bf16.msra.mxu0 %v2263_v28  ;;  %v2341_v28 = vld [vmem:[#allocation6 + $0x168] ss:$16 sps:$4 sm:$0xff]  }
 0x151   :  { %829 = vmatprep.subr.bf16.mxu0 %v2271_v32  ;;  %v2347_v32 = vld [vmem:[#allocation6 + $0x188] ss:$16 sps:$4 sm:$0xff]  }
 0x154   :  { %830 = vmatpush1.bf16.msra.mxu0 %v2269_v36  ;;  %v2353_v36 = vld [vmem:[#allocation6 + $0x1a8] ss:$16 sps:$4 sm:$0xff]  }
 0x155   :  { %1736 = vmatprep.subr.bf16.mxu0 %v2277_v38  ;;  %v2361_v38 = vld [vmem:[#allocation6 + $0x1cc] ss:$16 sps:$4 sm:$0xff]  }
 0x20a   :  { %v545_v26 = vpop.f32.mrb[4].mxu0 }
 0x20b   :  { %v546_v29 = vadd.f32 %v1908_v24, %v545_v26  ;;  %v2156_v30 = vpop.f32.mrb[5].mxu0  ;;  %v2335_v24 = vld [vmem:[#allocation6 + $0x148] ss:$16 sps:$4 sm:$0xff]   ;;  %v2343_v26 = vld [vmem:[#allocation6 + $0x16c] ss:$16 sps:$4 sm:$0xff]  }
 0x20c   :  { %v548_v33 = vpop.f32.mrb[6].mxu0  ;;  %v2349_v30 = vld [vmem:[#allocation6 + $0x18c] ss:$16 sps:$4 sm:$0xff]  }
 0x20d   :  { %1860 = vst [vmem:[%s2759_s11] sm:$0xff] %v546_v29  ;;  %v2157_v34 = vpop.f32.mrb[7].mxu0  ;;  %551 = vrot.lane.b32.xlu0 %v546_v29, %s2556_s6  ;;  %v2352_v33 = vld [vmem:[#allocation6 + $0x1a4] ss:$16 sps:$4 sm:$0xff]  }
 0x20e   :  { %v2355_v34 = vld [vmem:[#allocation6 + $0x1ac] ss:$16 sps:$4 sm:$0xff]  }
 0x27f   :  { %v552_v39 = vpop.permute.xlu0 %551 }
 0x280   :  { %v553_v40 = vmul.f32 0.5, %v552_v39  ;;  %v2356_v39 = vld [vmem:[#allocation6 + $0x1c0] ss:$16 sps:$4 sm:$0xff]  }
 0x282   :  { %v554_v41 = vmul.f32 1.442695, %v553_v40  ;;  %v2359_v40 = vld [vmem:[#allocation6 + $0x1c8] ss:$16 sps:$4 sm:$0xff]  }
 0x284   :  { %2464 = vpow2.f32 %v554_v41  ;;  %v2364_v41 = vld [vmem:[#allocation6 + $0x1e4] ss:$16 sps:$4 sm:$0xff]  }
 0x28e   :  { %v2465_v43 = vpop.eup %2464 }
 0x28f   :  { %v557_v44 = vmul.f32 %v2465_v43, %v556_v42  ;;  %v2367_v42 = vld [vmem:[#allocation6 + $0x1ec] ss:$16 sps:$4 sm:$0xff]   ;;  %v2362_v43 = vld [vmem:[#allocation6 + $0x1e0] ss:$16 sps:$4 sm:$0xff]  }
 0x291   :  { %v558_v45 = vadd.f32 %v557_v44, %v546_v29  ;;  %v2346_v29 = vld [vmem:[#allocation6 + $0x184] ss:$16 sps:$4 sm:$0xff]   ;;  %v2365_v44 = vld [vmem:[#allocation6 + $0x1e8] ss:$16 sps:$4 sm:$0xff]  }
 0x293   :  { %v559_v48 = vpack.c.bf16 %v558_v45, %v558_v45  ;;  %v2370_v45 = vld [vmem:[#allocation6 + $0x204] ss:$16 sps:$4 sm:$0xff]  }
 0x295   :  { %807 = vmatmul.mubr.bf16.vlgmr.msra.gmra.mrb[4].mxu1 %v559_v48  ;;  %848 = vmatmul.mubr.bf16.vlgmr.msra.gmra.mrb[8].mxu0 %v559_v48 }
 0x296   :  { %1655 = vmatpush1.bf16.msra.mxu1 %v2272_v46  ;;  %1737 = vmatpush1.bf16.msra.mxu0 %v2275_v47  ;;  %v2373_v46 = vld [vmem:[#allocation6 + $0x20c] ss:$16 sps:$4 sm:$0xff]   ;;  %v594_v47 = vlaneseq }
 0x297   :  { %1656 = vmatprep.subr.bf16.mxu1 %v2280_v49  ;;  %1738 = vmatprep.subr.bf16.mxu0 %v2283_v50  ;;  %v2715_v50 = vld [vmem:[%s2755_s7] sm:$0xf] }
 0x298   :  { %v2709_v48 = vshrl.u32 %v594_v47, 7  ;;  %v2430_v47 = vld [vmem:[#allocation6 + $0x344] ss:$16 sps:$4 sm:$0xff]  }
 0x29a   :  { %1657 = vmatpush1.bf16.msra.mxu1 %v2278_v51  ;;  %1739 = vmatpush1.bf16.msra.mxu0 %v2281_v52  ;;  %v596_v49 = vsub.s32 0, %v2709_v48  ;;  %v600_v51 = vsub.s32 1, %v2709_v48  ;;  %v608_v52 = vsub.s32 3, %v2709_v48 }
 0x29b   :  { %1658 = vmatprep.subr.bf16.mxu1 %v2286_v53  ;;  %1740 = vmatprep.subr.bf16.mxu0 %v2289_v54 }
 0x29c   :  { %v597_v53 = vrot.slane %v2715_v50, %v596_v49  ;;  %v601_v54 = vrot.slane %v2715_v50, %v600_v51 }
 0x29e   :  { %1659 = vmatpush1.bf16.msra.mxu1 %v2284_v55  ;;  %1741 = vmatpush1.bf16.msra.mxu0 %v2287_v56  ;;  %v609_v55 = vrot.slane %v2715_v50, %v608_v52 }
 0x29f   :  { %1660 = vmatprep.subr.bf16.mxu1 %v2292_v57  ;;  %1742 = vmatprep.subr.bf16.mxu0 %v2295_v58 }
 0x2a2   :  { %1661 = vmatpush1.bf16.msra.mxu1 %v2290_v59  ;;  %1743 = vmatpush1.bf16.msra.mxu0 %v2293_v60 }
 0x2a3   :  { %1662 = vmatprep.subr.bf16.mxu1 %v2298_v61  ;;  %1744 = vmatprep.subr.bf16.mxu0 %v2301_v62 }
 0x2a6   :  { %1663 = vmatpush1.bf16.msra.mxu1 %v2296_v63  ;;  %1745 = vmatpush1.bf16.msra.mxu0 %v2299_v0 }
 0x2a7   :  { %1664 = vmatprep.subr.bf16.mxu1 %v2304_v1  ;;  %1746 = vmatprep.subr.bf16.mxu0 %v2307_v2 }
 0x2aa   :  { %1665 = vmatpush1.bf16.msra.mxu1 %v2302_v3  ;;  %1747 = vmatpush1.bf16.msra.mxu0 %v2305_v4 }
 0x2ab   :  { %1666 = vmatprep.subr.bf16.mxu1 %v2310_v5  ;;  %1748 = vmatprep.subr.bf16.mxu0 %v2313_v6 }
 0x2ae   :  { %1667 = vmatpush1.bf16.msra.mxu1 %v2308_v7  ;;  %1749 = vmatpush1.bf16.msra.mxu0 %v2311_v8  ;;  %v2368_v7 = vld [vmem:[#allocation6 + $0x200] ss:$16 sps:$4 sm:$0xff]   ;;  %v2371_v8 = vld [vmem:[#allocation6 + $0x208] ss:$16 sps:$4 sm:$0xff]  }
 0x2af   :  { %1668 = vmatprep.subr.bf16.mxu1 %v2316_v9  ;;  %1750 = vmatprep.subr.bf16.mxu0 %v2319_v10  ;;  %v2376_v10 = vld [vmem:[#allocation6 + $0x224] ss:$16 sps:$4 sm:$0xff]  }
 0x2b2   :  { %1669 = vmatpush1.bf16.msra.mxu1 %v2314_v11  ;;  %1751 = vmatpush1.bf16.msra.mxu0 %v2317_v12  ;;  %v2379_v11 = vld [vmem:[#allocation6 + $0x22c] ss:$16 sps:$4 sm:$0xff]  }
 0x2b3   :  { %1670 = vmatprep.subr.bf16.mxu1 %v2322_v13  ;;  %1752 = vmatprep.subr.bf16.mxu0 %v2325_v14  ;;  %v2374_v13 = vld [vmem:[#allocation6 + $0x220] ss:$16 sps:$4 sm:$0xff]   ;;  %v2377_v14 = vld [vmem:[#allocation6 + $0x228] ss:$16 sps:$4 sm:$0xff]  }
 0x2b6   :  { %1671 = vmatpush1.bf16.msra.mxu1 %v2320_v15  ;;  %1753 = vmatpush1.bf16.msra.mxu0 %v2323_v16  ;;  %v2382_v15 = vld [vmem:[#allocation6 + $0x244] ss:$16 sps:$4 sm:$0xff]   ;;  %v2385_v16 = vld [vmem:[#allocation6 + $0x24c] ss:$16 sps:$4 sm:$0xff]  }
 0x2b7   :  { %1672 = vmatprep.subr.bf16.mxu1 %v2328_v17  ;;  %1754 = vmatprep.subr.bf16.mxu0 %v2331_v18  ;;  %v2380_v17 = vld [vmem:[#allocation6 + $0x240] ss:$16 sps:$4 sm:$0xff]   ;;  %v2383_v18 = vld [vmem:[#allocation6 + $0x248] ss:$16 sps:$4 sm:$0xff]  }
 0x2ba   :  { %1673 = vmatpush1.bf16.msra.mxu1 %v2326_v19  ;;  %1755 = vmatpush1.bf16.msra.mxu0 %v2329_v20  ;;  %v2388_v19 = vld [vmem:[#allocation6 + $0x264] ss:$16 sps:$4 sm:$0xff]   ;;  %v2391_v20 = vld [vmem:[#allocation6 + $0x26c] ss:$16 sps:$4 sm:$0xff]  }
 0x2bb   :  { %1674 = vmatprep.subr.bf16.mxu1 %v2334_v21  ;;  %1756 = vmatprep.subr.bf16.mxu0 %v2337_v22  ;;  %v2386_v21 = vld [vmem:[#allocation6 + $0x260] ss:$16 sps:$4 sm:$0xff]   ;;  %v2389_v22 = vld [vmem:[#allocation6 + $0x268] ss:$16 sps:$4 sm:$0xff]  }
 0x2be   :  { %1675 = vmatpush1.bf16.msra.mxu1 %v2332_v23  ;;  %1757 = vmatpush1.bf16.msra.mxu0 %v2335_v24  ;;  %v2394_v23 = vld [vmem:[#allocation6 + $0x284] ss:$16 sps:$4 sm:$0xff]   ;;  %v2397_v24 = vld [vmem:[#allocation6 + $0x28c] ss:$16 sps:$4 sm:$0xff]  }
 0x2bf   :  { %1676 = vmatprep.subr.bf16.mxu1 %v2340_v25  ;;  %1758 = vmatprep.subr.bf16.mxu0 %v2343_v26  ;;  %v2392_v25 = vld [vmem:[#allocation6 + $0x280] ss:$16 sps:$4 sm:$0xff]   ;;  %v2395_v26 = vld [vmem:[#allocation6 + $0x288] ss:$16 sps:$4 sm:$0xff]  }
 0x2c2   :  { %1677 = vmatpush1.bf16.msra.mxu1 %v2338_v27  ;;  %1759 = vmatpush1.bf16.msra.mxu0 %v2341_v28  ;;  %v2400_v27 = vld [vmem:[#allocation6 + $0x2a4] ss:$16 sps:$4 sm:$0xff]   ;;  %v2403_v28 = vld [vmem:[#allocation6 + $0x2ac] ss:$16 sps:$4 sm:$0xff]  }
 0x2c3   :  { %1678 = vmatprep.subr.bf16.mxu1 %v2346_v29  ;;  %1760 = vmatprep.subr.bf16.mxu0 %v2349_v30  ;;  %v2398_v29 = vld [vmem:[#allocation6 + $0x2a0] ss:$16 sps:$4 sm:$0xff]   ;;  %v2401_v30 = vld [vmem:[#allocation6 + $0x2a8] ss:$16 sps:$4 sm:$0xff]  }
 0x2c6   :  { %1679 = vmatpush1.bf16.msra.mxu1 %v2344_v31  ;;  %1761 = vmatpush1.bf16.msra.mxu0 %v2347_v32  ;;  %v2406_v31 = vld [vmem:[#allocation6 + $0x2c4] ss:$16 sps:$4 sm:$0xff]   ;;  %v2409_v32 = vld [vmem:[#allocation6 + $0x2cc] ss:$16 sps:$4 sm:$0xff]  }
 0x2c7   :  { %1680 = vmatprep.subr.bf16.mxu1 %v2352_v33  ;;  %1762 = vmatprep.subr.bf16.mxu0 %v2355_v34  ;;  %v2404_v33 = vld [vmem:[#allocation6 + $0x2c0] ss:$16 sps:$4 sm:$0xff]   ;;  %v2407_v34 = vld [vmem:[#allocation6 + $0x2c8] ss:$16 sps:$4 sm:$0xff]  }
 0x2ca   :  { %1681 = vmatpush1.bf16.msra.mxu1 %v2350_v35  ;;  %1763 = vmatpush1.bf16.msra.mxu0 %v2353_v36  ;;  %v2412_v35 = vld [vmem:[#allocation6 + $0x2e4] ss:$16 sps:$4 sm:$0xff]   ;;  %v2415_v36 = vld [vmem:[#allocation6 + $0x2ec] ss:$16 sps:$4 sm:$0xff]  }
 0x2cb   :  { %1682 = vmatprep.subr.bf16.mxu1 %v2358_v37  ;;  %1764 = vmatprep.subr.bf16.mxu0 %v2361_v38  ;;  %v2410_v37 = vld [vmem:[#allocation6 + $0x2e0] ss:$16 sps:$4 sm:$0xff]   ;;  %v2413_v38 = vld [vmem:[#allocation6 + $0x2e8] ss:$16 sps:$4 sm:$0xff]  }
 0x2ce   :  { %1683 = vmatpush1.bf16.msra.mxu1 %v2356_v39  ;;  %1765 = vmatpush1.bf16.msra.mxu0 %v2359_v40  ;;  %v2418_v39 = vld [vmem:[#allocation6 + $0x304] ss:$16 sps:$4 sm:$0xff]   ;;  %v2421_v40 = vld [vmem:[#allocation6 + $0x30c] ss:$16 sps:$4 sm:$0xff]  }
 0x2cf   :  { %1684 = vmatprep.subr.bf16.mxu1 %v2364_v41  ;;  %1766 = vmatprep.subr.bf16.mxu0 %v2367_v42  ;;  %v2416_v41 = vld [vmem:[#allocation6 + $0x300] ss:$16 sps:$4 sm:$0xff]   ;;  %v2419_v42 = vld [vmem:[#allocation6 + $0x308] ss:$16 sps:$4 sm:$0xff]  }
 0x2d2   :  { %1685 = vmatpush1.bf16.msra.mxu1 %v2362_v43  ;;  %1767 = vmatpush1.bf16.msra.mxu0 %v2365_v44  ;;  %v2424_v43 = vld [vmem:[#allocation6 + $0x324] ss:$16 sps:$4 sm:$0xff]   ;;  %v2427_v44 = vld [vmem:[#allocation6 + $0x32c] ss:$16 sps:$4 sm:$0xff]  }
 0x2d3   :  { %1695 = vmatprep.subr.bf16.mxu1 %v2370_v45  ;;  %1777 = vmatprep.subr.bf16.mxu0 %v2373_v46  ;;  %v2422_v45 = vld [vmem:[#allocation6 + $0x320] ss:$16 sps:$4 sm:$0xff]   ;;  %v2425_v46 = vld [vmem:[#allocation6 + $0x328] ss:$16 sps:$4 sm:$0xff]  }
 0x368   :  { %v808_v56 = vpop.f32.mrb[4].mxu1  ;;  %v2728_v57 = vpop.f32.mrb[8].mxu0 }
 0x369   :  { %v809_v58 = vadd.f32 %v808_v56, %v597_v53  ;;  %v810_v59 = vpop.f32.mrb[5].mxu1  ;;  %v851_v60 = vpop.f32.mrb[9].mxu0  ;;  %v2433_v53 = vld [vmem:[#allocation6 + $0x34c] ss:$16 sps:$4 sm:$0xff]   ;;  %v2436_v56 = vld [vmem:[#allocation6 + $0x364] ss:$16 sps:$4 sm:$0xff]  }
 0x36a   :  { %v811_v61 = vadd.f32 %v810_v59, %v601_v54  ;;  %v852_v62 = vadd.f32 %v851_v60, %v609_v55  ;;  %v812_v63 = vpop.f32.mrb[6].mxu1  ;;  %v853_v0 = vpop.f32.mrb[10].mxu0  ;;  %v2428_v54 = vld [vmem:[#allocation6 + $0x340] ss:$16 sps:$4 sm:$0xff]   ;;  %v2431_v55 = vld [vmem:[#allocation6 + $0x348] ss:$16 sps:$4 sm:$0xff]  }
 0x36b   :  { %v856_v1 = vmax.f32 %v809_v58, 0.0  ;;  %v813_v2 = vpop.f32.mrb[7].mxu1  ;;  %v854_v3 = vpop.f32.mrb[11].mxu0  ;;  %v2439_v58 = vld [vmem:[#allocation6 + $0x36c] ss:$16 sps:$4 sm:$0xff]  }
 0x36c   :  { %v857_v4 = vmax.f32 %v811_v61, 0.0  ;;  %v859_v5 = vmax.f32 %v852_v62, 0.0  ;;  %v2434_v59 = vld [vmem:[#allocation6 + $0x360] ss:$16 sps:$4 sm:$0xff]   ;;  %v2437_v60 = vld [vmem:[#allocation6 + $0x368] ss:$16 sps:$4 sm:$0xff]  }
 0x36d   :  { %v860_v9 = vpack.c.bf16 %v856_v1, %v856_v1  ;;  %v2442_v61 = vld [vmem:[#allocation6 + $0x384] ss:$16 sps:$4 sm:$0xff]   ;;  %v2445_v62 = vld [vmem:[#allocation6 + $0x38c] ss:$16 sps:$4 sm:$0xff]   ;;  %v2440_v63 = vld [vmem:[#allocation6 + $0x380] ss:$16 sps:$4 sm:$0xff]  }
 0x36e   :  { %v861_v6 = vpack.c.bf16 %v857_v4, %v857_v4  ;;  %v863_v12 = vpack.c.bf16 %v859_v5, %v859_v5  ;;  %v2443_v0 = vld [vmem:[#allocation6 + $0x388] ss:$16 sps:$4 sm:$0xff]   ;;  %v604_v1 = vsub.s32 2, %v2709_v48  ;;  %v2448_v2 = vld [vmem:[#allocation6 + $0x3a4] ss:$16 sps:$4 sm:$0xff]  }
 0x36f   :  { %v2451_v3 = vld [vmem:[#allocation6 + $0x3ac] ss:$16 sps:$4 sm:$0xff]   ;;  %v2446_v4 = vld [vmem:[#allocation6 + $0x3a0] ss:$16 sps:$4 sm:$0xff]   ;;  %v2449_v5 = vld [vmem:[#allocation6 + $0x3a8] ss:$16 sps:$4 sm:$0xff]  }
 0x370   :  { %1686 = vmatprep.mubr.bf16.mxu1 %v861_v6  ;;  %1768 = vmatprep.mubr.bf16.mxu0 %v861_v6  ;;  %v605_v6 = vrot.slane %v2715_v50, %v604_v1 }
 0x371   :  { %1687 = vmatmul.mubr.bf16.vlgmr.msra.gmra.mrb[8].mxu1 %v860_v9  ;;  %1769 = vmatmul.mubr.bf16.vlgmr.msra.gmra.mrb[12].mxu0 %v860_v9  ;;  %v2452_v9 = vld [vmem:[#allocation6 + $0x3c0] ss:$16 sps:$4 sm:$0xff]  }
 0x372   :  { %1696 = vmatpush1.bf16.msra.mxu1 %v2368_v7  ;;  %1778 = vmatpush1.bf16.msra.mxu0 %v2371_v8  ;;  %v2454_v7 = vld [vmem:[#allocation6 + $0x3c4] ss:$16 sps:$4 sm:$0xff]   ;;  %v2457_v8 = vld [vmem:[#allocation6 + $0x3cc] ss:$16 sps:$4 sm:$0xff]  }
 0x373   :  { %1727 = vmatprep.mubr.bf16.mxu1 %v863_v12  ;;  %1809 = vmatprep.mubr.bf16.mxu0 %v863_v12  ;;  %v2460_v12 = vld [vmem:[#allocation6 + $0x3e4] ss:$16 sps:$4 sm:$0xff]  }
 0x374   :  { %1697 = vmatprep.subr.bf16.mxu1 %v2376_v10  ;;  %1779 = vmatprep.subr.bf16.mxu0 %v2379_v11  ;;  %v2455_v10 = vld [vmem:[#allocation6 + $0x3c8] ss:$16 sps:$4 sm:$0xff]   ;;  %v850_v11 = vadd.f32 %v2728_v57, %v605_v6  ;;  %v992_v57 = vld [vmem:[%s2757_s9] sm:$0xf] }
 0x376   :  { %1698 = vmatpush1.bf16.msra.mxu1 %v2374_v13  ;;  %1780 = vmatpush1.bf16.msra.mxu0 %v2377_v14  ;;  %v2463_v13 = vld [vmem:[#allocation6 + $0x3ec] ss:$16 sps:$4 sm:$0xff]   ;;  %v2458_v14 = vld [vmem:[#allocation6 + $0x3e0] ss:$16 sps:$4 sm:$0xff]  }
 0x377   :  { %1699 = vmatprep.subr.bf16.mxu1 %v2382_v15  ;;  %1781 = vmatprep.subr.bf16.mxu0 %v2385_v16  ;;  %v2461_v15 = vld [vmem:[#allocation6 + $0x3e8] ss:$16 sps:$4 sm:$0xff]   ;;  %v858_v16 = vmax.f32 %v850_v11, 0.0 }
 0x379   :  { %v862_v50 = vpack.c.bf16 %v858_v16, %v858_v16 }
 0x37a   :  { %1700 = vmatpush1.bf16.msra.mxu1 %v2380_v17  ;;  %1782 = vmatpush1.bf16.msra.mxu0 %v2383_v18  ;;  %v997_v17 = vrot.slane %v992_v57, %v596_v49  ;;  %v1005_v18 = vrot.slane %v992_v57, %v604_v1 }
 0x37b   :  { %1701 = vmatprep.subr.bf16.mxu1 %v2388_v19  ;;  %1783 = vmatprep.subr.bf16.mxu0 %v2391_v20  ;;  %v1001_v19 = vrot.slane %v992_v57, %v600_v51  ;;  %v1009_v20 = vrot.slane %v992_v57, %v608_v52 }
 0x37e   :  { %1702 = vmatpush1.bf16.msra.mxu1 %v2386_v21  ;;  %1784 = vmatpush1.bf16.msra.mxu0 %v2389_v22 }
 0x37f   :  { %1703 = vmatprep.subr.bf16.mxu1 %v2394_v23  ;;  %1785 = vmatprep.subr.bf16.mxu0 %v2397_v24 }
 0x382   :  { %1704 = vmatpush1.bf16.msra.mxu1 %v2392_v25  ;;  %1786 = vmatpush1.bf16.msra.mxu0 %v2395_v26 }
 0x383   :  { %1705 = vmatprep.subr.bf16.mxu1 %v2400_v27  ;;  %1787 = vmatprep.subr.bf16.mxu0 %v2403_v28 }
 0x386   :  { %1706 = vmatpush1.bf16.msra.mxu1 %v2398_v29  ;;  %1788 = vmatpush1.bf16.msra.mxu0 %v2401_v30 }
 0x387   :  { %1707 = vmatprep.subr.bf16.mxu1 %v2406_v31  ;;  %1789 = vmatprep.subr.bf16.mxu0 %v2409_v32 }
 0x38a   :  { %1708 = vmatpush1.bf16.msra.mxu1 %v2404_v33  ;;  %1790 = vmatpush1.bf16.msra.mxu0 %v2407_v34 }
 0x38b   :  { %1709 = vmatprep.subr.bf16.mxu1 %v2412_v35  ;;  %1791 = vmatprep.subr.bf16.mxu0 %v2415_v36 }
 0x38e   :  { %1710 = vmatpush1.bf16.msra.mxu1 %v2410_v37  ;;  %1792 = vmatpush1.bf16.msra.mxu0 %v2413_v38 }
 0x38f   :  { %1711 = vmatprep.subr.bf16.mxu1 %v2418_v39  ;;  %1793 = vmatprep.subr.bf16.mxu0 %v2421_v40 }
 0x392   :  { %1712 = vmatpush1.bf16.msra.mxu1 %v2416_v41  ;;  %1794 = vmatpush1.bf16.msra.mxu0 %v2419_v42 }
 0x393   :  { %1713 = vmatprep.subr.bf16.mxu1 %v2424_v43  ;;  %1795 = vmatprep.subr.bf16.mxu0 %v2427_v44 }
 0x396   :  { %1714 = vmatpush1.bf16.msra.mxu1 %v2422_v45  ;;  %1796 = vmatpush1.bf16.msra.mxu0 %v2425_v46 }
 0x397   :  { %1715 = vmatprep.subr.bf16.mxu1 %v2430_v47  ;;  %1797 = vmatprep.subr.bf16.mxu0 %v2433_v53 }
 0x39a   :  { %1716 = vmatpush1.bf16.msra.mxu1 %v2428_v54  ;;  %1798 = vmatpush1.bf16.msra.mxu0 %v2431_v55 }
 0x39b   :  { %1717 = vmatprep.subr.bf16.mxu1 %v2436_v56  ;;  %1799 = vmatprep.subr.bf16.mxu0 %v2439_v58 }
 0x39e   :  { %1718 = vmatpush1.bf16.msra.mxu1 %v2434_v59  ;;  %1800 = vmatpush1.bf16.msra.mxu0 %v2437_v60 }
 0x39f   :  { %1719 = vmatprep.subr.bf16.mxu1 %v2442_v61  ;;  %1801 = vmatprep.subr.bf16.mxu0 %v2445_v62 }
 0x3a2   :  { %1720 = vmatpush1.bf16.msra.mxu1 %v2440_v63  ;;  %1802 = vmatpush1.bf16.msra.mxu0 %v2443_v0 }
 0x3a3   :  { %1721 = vmatprep.subr.bf16.mxu1 %v2448_v2  ;;  %1803 = vmatprep.subr.bf16.mxu0 %v2451_v3 }
 0x3a6   :  { %1722 = vmatpush1.bf16.msra.mxu1 %v2446_v4  ;;  %1804 = vmatpush1.bf16.msra.mxu0 %v2449_v5 }
 0x3a7   :  { %1723 = vmatprep.subr.bf16.mxu1 %v2454_v7  ;;  %1805 = vmatprep.subr.bf16.mxu0 %v2457_v8 }
 0x3aa   :  { %1724 = vmatpush1.bf16.msra.mxu1 %v2452_v9  ;;  %1806 = vmatpush1.bf16.msra.mxu0 %v2455_v10 }
 0x3ab   :  { %1725 = vmatprep.subr.bf16.mxu1 %v2460_v12  ;;  %1807 = vmatprep.subr.bf16.mxu0 %v2463_v13 }
 0x3ae   :  { %1726 = vmatpush1.bf16.msra.mxu1 %v2458_v14  ;;  %1808 = vmatpush1.bf16.msra.mxu0 %v2461_v15 }
 0x3b1   :  { %1728 = vmatmul.mubr.bf16.vlgmr.msra.gmra.mrb[8].mxu1 %v862_v50  ;;  %1810 = vmatmul.mubr.bf16.vlgmr.msra.gmra.mrb[12].mxu0 %v862_v50 }
 0x484   :  { %v1729_v21 = vpop.f32.mrb[8].mxu1  ;;  %v1811_v22 = vpop.f32.mrb[12].mxu0 }
 0x485   :  { %v2158_v23 = vadd.f32 %v1729_v21, %v997_v17  ;;  %v2160_v24 = vadd.f32 %v1811_v22, %v1005_v18  ;;  %v1731_v25 = vpop.f32.mrb[9].mxu1  ;;  %v1813_v26 = vpop.f32.mrb[13].mxu0 }
 0x486   :  { %v2159_v27 = vadd.f32 %v1731_v25, %v1001_v19  ;;  %v2161_v28 = vadd.f32 %v1813_v26, %v1009_v20  ;;  %v1733_v29 = vpop.f32.mrb[10].mxu1  ;;  %v1815_v30 = vpop.f32.mrb[14].mxu0 }
 0x487   :  { %v2077_v31 = vmul.f32 -1.442695, %v2158_v23  ;;  %v2079_v32 = vmul.f32 -1.442695, %v2160_v24  ;;  %v1734_v49 = vpop.f32.mrb[11].mxu1  ;;  %v1816_v33 = vpop.f32.mrb[15].mxu0 }
 0x488   :  { %v2078_v34 = vmul.f32 -1.442695, %v2159_v27  ;;  %v2080_v35 = vmul.f32 -1.442695, %v2161_v28 }
 0x489   :  { %2466 = vpow2.f32 %v2077_v31 }
 0x48a   :  { %2468 = vpow2.f32 %v2079_v32 }
 0x48b   :  { %2470 = vpow2.f32 %v2078_v34 }
 0x48c   :  { %2472 = vpow2.f32 %v2080_v35 }
 0x493   :  { %v2467_v48 = vpop.eup %2466 }
 0x494   :  { %v2469_v51 = vpop.eup %2468  ;;  %v1830_v52 = vadd.f32 1.0, %v2467_v48 }
 0x495   :  { %v2471_v36 = vpop.eup %2470  ;;  %v1832_v37 = vadd.f32 1.0, %v2469_v51 }
 0x496   :  { %v2473_v38 = vpop.eup %2472  ;;  %2474 = vrcp.f32 %v1830_v52  ;;  %v1831_v39 = vadd.f32 1.0, %v2471_v36 }
 0x497   :  { %2476 = vrcp.f32 %v1832_v37  ;;  %v1833_v40 = vadd.f32 1.0, %v2473_v38 }
 0x498   :  { %2478 = vrcp.f32 %v1831_v39 }
 0x499   :  { %2480 = vrcp.f32 %v1833_v40 }
 0x4a0   :  { %v2475_v41 = vpop.eup %2474 }
 0x4a1   :  { %v2477_v42 = vpop.eup %2476 }
 0x4a2   :  { %v2479_v43 = vpop.eup %2478 }
 0x4a3   :  { %v2481_v44 = vpop.eup %2480  ;;  %v2083_v45 = vpack.c.bf16 %v2479_v43, %v2475_v41 }
 0x4a4   :  { %v2084_v46 = vpack.c.bf16 %v2481_v44, %v2477_v42 }
 0x4a5   :  { %1858 = vst [vmem:[%s2758_s10] sm:$0xff] %v2083_v45 }
 0x4a6   :  { %1859 = vst [vmem:[%s2758_s10 + $0x8] sm:$0xff] %v2084_v46 }
 0x4a7   :  { %1869 = vsyncpa [#allocation3], 1 }
 0x4a8   :  { %1870 = vsyncpa [#allocation5], 1 }

</bundles_post_ra>
